<compile_context>
chip_gen: v5e
topology: v5e:2x2
jax: 0.10.0
libtpu: 0.0.40
codegen_flags: <defaults>
</compile_context>

<pallas_src>
import functools

import jax
import jax.numpy as jnp
from jax.experimental import pallas as pl
from jax.experimental.pallas import tpu as pltpu

_LANE = 128
_SUBLANE = 8


def _mape_partial_kernel(x_ref, t_ref, out_ref, *, eps, beta, tr, rows, needs_mask):
    x = x_ref[...].astype(jnp.float32)
    t = t_ref[...].astype(jnp.float32)

    diff = x - t
    adiff = jnp.abs(diff)
    # SmoothL1 (Huber, beta), reduction='none'; static constants folded at trace time.
    smooth_l1 = jnp.where(adiff < beta, (0.5 / beta) * diff * diff, adiff - 0.5 * beta)
    ratio = smooth_l1 / (jnp.abs(t) + eps)

    if needs_mask:
        # Zero out rows past the true extent (last, partially out-of-bounds tile).
        row_in_block = jax.lax.broadcasted_iota(jnp.int32, (tr, _LANE), 0)
        global_row = row_in_block + pl.program_id(0) * tr
        ratio = jnp.where(global_row < rows, ratio, 0.0)

    # Reduce only along the leading (non-sublane/lane) axis: tr//8 VPU vector
    # adds per step, no XLU cross-lane reduce inside the kernel.
    partial = ratio.reshape(tr // _SUBLANE, _SUBLANE, _LANE).sum(axis=0)
    out_ref[...] = partial[None]


def _smooth_l1_ratio(x, t, eps, beta):
    d = x - t
    ad = jnp.abs(d)
    sl1 = jnp.where(ad < beta, (0.5 / beta) * d * d, ad - 0.5 * beta)
    return sl1 / (jnp.abs(t) + eps)


def mape_loss(inp, tgt, eps=1e-06, beta=1.0):
    assert inp.shape == tgt.shape
    n = inp.size
    x_flat = inp.reshape(-1)
    t_flat = tgt.reshape(-1)

    total = jnp.float32(0.0)

    rows = n // _LANE
    n_main = rows * _LANE

    # Unaligned tail (< 128 elems): reduce in plain JAX. Avoids a full
    # host-side jnp.pad copy of both inputs (which would double HBM traffic).
    if n_main < n:
        xt = x_flat[n_main:].astype(jnp.float32)
        tt = t_flat[n_main:].astype(jnp.float32)
        total = total + jnp.sum(_smooth_l1_ratio(xt, tt, eps, beta))

    if rows > 0:
        x2 = x_flat[:n_main].reshape(rows, _LANE)
        t2 = t_flat[:n_main].reshape(rows, _LANE)

        # 2048 x 128 f32 = 1 MiB per input block for large inputs; with double
        # buffering that is 2 inputs x 2 bufs x 1 MiB = 4 MiB VMEM, well under
        # the scoped default on v5e/v6e/v7x while amortizing the ~0.35 us
        # per-grid-step overhead. Small inputs get one 8-aligned block.
        tr = 2048 if rows >= 2048 else _SUBLANE * pl.cdiv(rows, _SUBLANE)
        grid = pl.cdiv(rows, tr)
        needs_mask = (rows % tr) != 0

        kernel = functools.partial(
            _mape_partial_kernel,
            eps=eps, beta=beta, tr=tr, rows=rows, needs_mask=needs_mask)

        partials = pl.pallas_call(
            kernel,
            out_shape=jax.ShapeDtypeStruct((grid, _SUBLANE, _LANE), jnp.float32),
            grid_spec=pltpu.PrefetchScalarGridSpec(
                num_scalar_prefetch=0,
                grid=(grid,),
                in_specs=[
                    pl.BlockSpec((tr, _LANE), lambda i: (i, 0)),
                    pl.BlockSpec((tr, _LANE), lambda i: (i, 0)),
                ],
                out_specs=pl.BlockSpec((1, _SUBLANE, _LANE), lambda i: (i, 0, 0)),
            ),
            compiler_params=pltpu.CompilerParams(
                dimension_semantics=("parallel",)),
        )(x2, t2)

        # Single cross-lane reduce of the tiny (grid, 8, 128) partial-sum slab.
        total = total + jnp.sum(partials, dtype=jnp.float32)

    return (100.0 * total / n).astype(jnp.float32)


def _reference(inp, tgt, eps=1e-06, beta=1.0):
    x = inp.astype(jnp.float32)
    t = tgt.astype(jnp.float32)
    return 100.0 * jnp.mean(_smooth_l1_ratio(x, t, eps, beta))


if __name__ == "__main__":
    key = jax.random.PRNGKey(0)

    # Primary test: lane-aligned size, consistent with a generic regression use.
    k1, k2 = jax.random.split(key)
    shape = (2, 4, 16, 16)
    inp = jax.random.normal(k1, shape, dtype=jnp.float32)
    tgt = jax.random.normal(k2, shape, dtype=jnp.float32)

    out = mape_loss(inp, tgt)
    jax.block_until_ready(out)
    ref = _reference(inp, tgt)
    assert jnp.allclose(out, ref, rtol=1e-4, atol=1e-4), (out, ref)

    # Secondary test: unaligned size -> exercises the in-kernel row mask and
    # the plain-JAX tail path (no full-array pad).
    k3, k4 = jax.random.split(k1)
    shape2 = (2, 4, 17, 17)  # 2312 elements: 18 full rows of 128 + 8-elem tail
    inp2 = jax.random.normal(k3, shape2, dtype=jnp.float32)
    tgt2 = jax.random.normal(k4, shape2, dtype=jnp.float32)

    out2 = mape_loss(inp2, tgt2)
    jax.block_until_ready(out2)
    ref2 = _reference(inp2, tgt2)
    assert jnp.allclose(out2, ref2, rtol=1e-4, atol=1e-4), (out2, ref2)

    print("KERNEL_OK")
</pallas_src>

<mosaic_0001>
module attributes {stable_mosaic.version = 11 : i64} {
  func.func @_mape_partial_kernel(%arg0: i32, %arg1: memref<16x128xf32, #tpu.memory_space<vmem>>, %arg2: memref<16x128xf32, #tpu.memory_space<vmem>>, %arg3: memref<1x8x128xf32, #tpu.memory_space<vmem>>) attributes {dimension_semantics = [#tpu.dimension_semantics<parallel>], iteration_bounds = array<i64: 1>, scalar_prefetch = 0 : i64, scratch_operands = 0 : i64, tpu.core_type = #tpu.core_type<tc>, window_params = [{transform_indices = @transform_0, window_bounds = array<i64: 16, 128>}, {transform_indices = @transform_1, window_bounds = array<i64: 16, 128>}, {transform_indices = @transform_2, window_bounds = array<i64: 1, 8, 128>}]} {
    %c0 = arith.constant 0 : index
    %c0_0 = arith.constant 0 : index
    %0 = vector.load %arg1[%c0, %c0_0] : memref<16x128xf32, #tpu.memory_space<vmem>>, vector<16x128xf32>
    %c0_1 = arith.constant 0 : index
    %c0_2 = arith.constant 0 : index
    %1 = vector.load %arg2[%c0_1, %c0_2] : memref<16x128xf32, #tpu.memory_space<vmem>>, vector<16x128xf32>
    %2 = arith.subf %0, %1 : vector<16x128xf32>
    %3 = math.absf %2 : vector<16x128xf32>
    %cst = arith.constant 1.000000e+00 : f32
    %4 = vector.broadcast %cst : f32 to vector<16x128xf32>
    %5 = arith.cmpf olt, %3, %4 : vector<16x128xf32>
    %cst_3 = arith.constant 5.000000e-01 : f32
    %6 = vector.broadcast %cst_3 : f32 to vector<16x128xf32>
    %7 = arith.mulf %6, %2 : vector<16x128xf32>
    %8 = arith.mulf %7, %2 : vector<16x128xf32>
    %cst_4 = arith.constant 5.000000e-01 : f32
    %9 = vector.broadcast %cst_4 : f32 to vector<16x128xf32>
    %10 = arith.subf %3, %9 : vector<16x128xf32>
    %11 = arith.select %5, %8, %10 : vector<16x128xi1>, vector<16x128xf32>
    %12 = math.absf %1 : vector<16x128xf32>
    %cst_5 = arith.constant 9.99999997E-7 : f32
    %13 = vector.broadcast %cst_5 : f32 to vector<16x128xf32>
    %14 = arith.addf %12, %13 : vector<16x128xf32>
    %15 = arith.divf %11, %14 : vector<16x128xf32>
    %16 = vector.shape_cast %15 : vector<16x128xf32> to vector<2x8x128xf32>
    %cst_6 = arith.constant dense<0.000000e+00> : vector<8x128xf32>
    %17 = vector.multi_reduction <add>, %16, %cst_6 [0] : vector<2x8x128xf32> to vector<8x128xf32>
    %18 = vector.shape_cast %17 : vector<8x128xf32> to vector<1x8x128xf32>
    %c0_7 = arith.constant 0 : index
    %c0_8 = arith.constant 0 : index
    %c0_9 = arith.constant 0 : index
    %19 = vector.load %arg3[%c0_7, %c0_8, %c0_9] : memref<1x8x128xf32, #tpu.memory_space<vmem>>, vector<1x8x128xf32>
    tpu.vector_store %arg3[%c0_7, %c0_8, %c0_9], %18 {strides = array<i32>} : memref<1x8x128xf32, #tpu.memory_space<vmem>>, vector<1x8x128xf32>,
    return
  }
  func.func @transform_0(%arg0: i32) -> (i32, i32) {
    %c0_i32 = arith.constant 0 : i32
    %c0_i32_0 = arith.constant 0 : i32
    return %arg0, %c0_i32 : i32, i32
  }
  func.func @transform_1(%arg0: i32) -> (i32, i32) {
    %c0_i32 = arith.constant 0 : i32
    %c0_i32_0 = arith.constant 0 : i32
    return %arg0, %c0_i32 : i32, i32
  }
  func.func @transform_2(%arg0: i32) -> (i32, i32, i32) {
    %c0_i32 = arith.constant 0 : i32
    %c0_i32_0 = arith.constant 0 : i32
    %c0_i32_1 = arith.constant 0 : i32
    return %arg0, %c0_i32, %c0_i32_0 : i32, i32, i32
  }
}

</mosaic_0001>

<bundles_post_ra>
// kernel: tpu_custom_call.1
= control target key start
LH: loop header
LB: loop body
LE: loop exit
PB: predicated region body
PF: predicated region fallthrough
CT: control target
= control target key end

     0   :  { %7 = vsyncpa [#allocation3], 0  ;;  %s248_s0 = inlined_call_operand.hbm [shape: f32[16,128], index: 0, kind: input, shape index: {}]   ;;  %s249_s1 = inlined_call_operand.hbm [shape: f32[16,128], index: 1, kind: input, shape index: {}]   ;;  %s250_s2 = inlined_call_operand.hbm [shape: f32[1,8,128], index: 2, kind: output, shape index: {}]  }
   0x1   :  { %8 = vsyncpa [#allocation6], 0 }
   0x2   :  { %9 = vsyncpa [#allocation4], 0  ;;  %s14_s11 = sshll.u32 %s248_s0, 4  ;;  %s205_s12 = smov [#allocation2]   ;;  %s15_s11 = int_to_ptr.hbm [resolvable:$true] %s14_s11 }
   0x3   :  { %s16_s13 = sshll.u32 %s205_s12, 4  ;;  %s27_s16 = sshll.u32 %s249_s1, 4  ;;  %s17_s13 = int_to_ptr.vmem [resolvable:$true] %s16_s13  ;;  %s28_s16 = int_to_ptr.hbm [resolvable:$true] %s27_s16 }
   0x4   :  { %s206_s17 = smov 128   ;;  %s207_s18 = smov 8  }
   0x5   :  { %22 = dma.hbm_to_vmem [thread:$0]  %s15_s11, 256, %s17_s13, [#allocation3], %s206_s17, %s206_s17, %s207_s18  }
   0x6   :  { %s208_s19 = smov [#allocation5]  }
   0x7   :  { %s29_s20 = sshll.u32 %s208_s19, 4  ;;  %s30_s20 = int_to_ptr.vmem [resolvable:$true] %s29_s20 }
   0x8   :  { %35 = dma.hbm_to_vmem [thread:$0]  %s28_s16, 256, %s30_s20, [#allocation6], %s206_s17, %s206_s17, %s207_s18  }
   0x9   :  { %199 = dma.done.wait [#allocation3], 256  }
   0xa   :  { %200 = vsyncadd [#allocation3], 4294967040 }
   0xb   :  { %201 = dma.done.wait [#allocation6], 256  }
   0xc   :  { %202 = vsyncadd [#allocation6], 4294967040  ;;  %v46_v0 = vld [vmem:[#allocation5] sm:$0xff]  ;;  %v47_v1 = vld [vmem:[#allocation5 + $0x8] sm:$0xff]  ;;  %s209_s0 = smov [#allocation7]   ;;  %s105_s23 = sshll.u32 %s250_s2, 4  ;;  %s106_s23 = int_to_ptr.hbm [resolvable:$true] %s105_s23 }
   0xd   :  { %v62_v2 = vand.u32 2147483647, %v46_v0  ;;  %v44_v3 = vld [vmem:[#allocation2] sm:$0xff]  ;;  %v63_v4 = vand.u32 2147483647, %v47_v1  ;;  %v45_v7 = vld [vmem:[#allocation2 + $0x8] sm:$0xff] }
   0xe   :  { %v48_v8 = vsub.f32 %v44_v3, %v46_v0  ;;  %v49_v9 = vsub.f32 %v45_v7, %v47_v1  ;;  %s103_s1 = sshll.u32 %s209_s0, 4  ;;  %s104_s1 = int_to_ptr.vmem [resolvable:$true] %s103_s1 }
   0xf   :  { %v64_v5 = vadd.f32 1e-06, %v62_v2  ;;  %v65_v6 = vadd.f32 1e-06, %v63_v4 }
  0x10   :  { %v50_v10 = vand.u32 2147483647, %v48_v8  ;;  %v54_v12 = vmul.f32 0.5, %v48_v8  ;;  %v51_v13 = vand.u32 2147483647, %v49_v9  ;;  %v55_v17 = vmul.f32 0.5, %v49_v9 }
  0x11   :  { %123 = vrcp.f32 %v64_v5  ;;  %vm71_vm1 = vweird.f32 %v64_v5  ;;  %v77_v18 = vand.u32 2147483648, %v64_v5  ;;  %v75_v20 = vand.u32 2147483647, %v64_v5 }
  0x12   :  { %125 = vrcp.f32 %v65_v6  ;;  %vm231_vm0 = vcmp.lt.f32.partialorder %v50_v10, 1.0  ;;  %v56_v22 = vmul.f32 %v54_v12, %v48_v8  ;;  %v116_v23 = vadd.f32 -0.5, %v50_v10 }
  0x13   :  { %vm86_vm3 = vweird.f32 %v65_v6  ;;  %v92_v24 = vand.u32 2147483648, %v65_v6  ;;  %v90_v27 = vand.u32 2147483647, %v65_v6  ;;  %v57_v28 = vmul.f32 %v55_v17, %v49_v9 }
  0x14   :  { %v117_v29 = vadd.f32 -0.5, %v51_v13  ;;  %v78_v30 = vor.u32 1.1754944e-38, %v77_v18  ;;  %vm236_vm6 = vcmp.lt.f32.partialorder %v51_v13, 1.0  ;;  %vm76_vm7 = vcmp.eq.f32.partialorder %v75_v20, 8.507059e+37 }
  0x15   :  { %v60_v34 = vsel %vm231_vm0, %v56_v22, %v116_v23  ;;  %v93_v35 = vor.u32 1.1754944e-38, %v92_v24  ;;  %vm91_vm9 = vcmp.eq.f32.partialorder %v90_v27, 8.507059e+37 }
  0x16   :  { %v61_v38 = vsel %vm236_vm6, %v57_v28, %v117_v29 }
  0x17   :  { %v124_v11 = vpop.eup %123 }
  0x18   :  { %v67_v14 = vmul.f32 %v124_v11, %v64_v5  ;;  %v126_v15 = vpop.eup %125  ;;  %vm72_vm2 = vweird.f32 %v124_v11 }
  0x19   :  { %v82_v21 = vmul.f32 %v126_v15, %v65_v6  ;;  %vm87_vm4 = vweird.f32 %v126_v15  ;;  %vm73_vm5 = vmor %vm71_vm1, %vm72_vm2 }
  0x1a   :  { %v68_v19 = vsub.f32 1.0, %v67_v14  ;;  %vm88_vm8 = vmor %vm86_vm3, %vm87_vm4 }
  0x1b   :  { %v83_v26 = vsub.f32 1.0, %v82_v21 }
  0x1c   :  { %v69_v25 = vmul.f32 %v124_v11, %v68_v19 }
  0x1d   :  { %v84_v33 = vmul.f32 %v126_v15, %v83_v26 }
  0x1e   :  { %v70_v32 = vadd.f32 %v124_v11, %v69_v25 }
  0x1f   :  { %v85_v37 = vadd.f32 %v126_v15, %v84_v33 }
  0x20   :  { %v74_v36 = vsel %vm73_vm5, %v124_v11, %v70_v32 }
  0x21   :  { %v79_v39 = vsel %vm76_vm7, %v78_v30, %v74_v36  ;;  %v89_v41 = vsel %vm88_vm8, %v126_v15, %v85_v37 }
  0x22   :  { %v80_v40 = vmul.f32 %v79_v39, %v60_v34  ;;  %v94_v42 = vsel %vm91_vm9, %v93_v35, %v89_v41 }
  0x23   :  { %v95_v43 = vmul.f32 %v94_v42, %v61_v38 }
  0x25   :  { %v96_v44 = vadd.f32 %v95_v43, %v80_v40 }
  0x27   :  { %97 = vst [vmem:[#allocation7] sm:$0xff] %v96_v44 }
  0x28   :  { %108 = dma.vmem_to_hbm [thread:$0]  %s104_s1, 128, %s106_s23, [#allocation4]  }
  0x29   :  { %203 = dma.done.wait [#allocation4], 128  }
  0x2a   :  { %204 = vsyncadd [#allocation4], 4294967168 }
  0x2b   :  { %113 = vsyncpa [#allocation3], 1 }
  0x2c   :  { %114 = vsyncpa [#allocation6], 1 }
  0x2d   :  { %115 = vsyncpa [#allocation4], 1 }

</bundles_post_ra>
